<compile_context>
chip_gen: v5e
topology: v5e:2x2
jax: 0.10.0
libtpu: 0.0.40
codegen_flags: <defaults>
</compile_context>

<pallas_src>
import jax
import jax.numpy as jnp
from jax.experimental import pallas as pl
from jax.experimental.pallas import tpu as pltpu

LANES = 128
TARGET_BLOCK_BYTES = 2 * 1024 * 1024   # ~2 MiB per block (safe on v5e/v6e/v7x)
MIN_PALLAS_BYTES = 2 * 1024 * 1024     # below this, XLA's fused FMA wins
MIN_GRID_STEPS = 8                     # keep both v7x TensorCores fed


def _linear_kernel(w_ref, b_ref, x_ref, o_ref):
    # w_ref, b_ref: (1,) f32 SMEM scalars; x_ref/o_ref: (tile_rows, 128) VMEM.
    x = x_ref[...].astype(jnp.float32)
    o_ref[...] = (x * w_ref[0] + b_ref[0]).astype(o_ref.dtype)


def _sublane_multiple(dtype):
    # (8,128) vreg tile for 32-bit; sub-32-bit dtypes pack along sublanes.
    itemsize = jnp.dtype(dtype).itemsize
    return max(8, 32 // itemsize)


def _round_up(v, m):
    return ((v + m - 1) // m) * m


def linear_forward(x, w, b, *, tile_rows=None, force_pallas=False):
    """nn.Linear(1, 1) forward.  x: (N, 1), w: (1, 1), b: (1,) -> (N, 1)."""
    n, in_f = x.shape
    assert in_f == 1 and w.shape == (1, 1) and b.shape == (1,)
    dtype = x.dtype
    itemsize = jnp.dtype(dtype).itemsize
    sub = _sublane_multiple(dtype)

    # Tiny tensors: launch + per-grid-step overhead dwarfs the few KiB of HBM
    # traffic; let XLA fuse the elementwise FMA instead.
    if n * itemsize < MIN_PALLAS_BYTES and not force_pallas:
        return x * w[0, 0] + b[0]

    # --- Lane-dense re-layout ------------------------------------------------
    if n % LANES == 0:
        # Fast path: free metadata reshape, no pad, no output slice.
        rows = n // LANES
        x2d = x.reshape(rows, LANES)
        tail_pad = 0
    else:
        # Fallback: pad flat input up to the next lane multiple (one O(N)
        # copy in, one O(N) slice out).
        # TODO(synk): replace with a manual masked-tail DMA path (pl.ANY +
        # pltpu.store(mask=...)) to remove these copies for ragged N too.
        rows = pl.cdiv(n, LANES)
        tail_pad = rows * LANES - n
        x2d = jnp.pad(x.reshape(-1), (0, tail_pad)).reshape(rows, LANES)

    # --- Pick a block size ---------------------------------------------------
    if tile_rows is None:
        tile_rows = max(sub, TARGET_BLOCK_BYTES // (LANES * itemsize))
    tile_rows = _round_up(int(tile_rows), sub)
    # Ensure at least MIN_GRID_STEPS grid steps (when there are enough rows)
    # so the "parallel" axis load-balances across v7x's two TensorCores.
    if rows > MIN_GRID_STEPS * sub:
        tile_rows = min(tile_rows, _round_up(pl.cdiv(rows, MIN_GRID_STEPS), sub))
    tile_rows = min(tile_rows, _round_up(rows, sub))
    num_tiles = pl.cdiv(rows, tile_rows)

    w1 = w.reshape(1).astype(jnp.float32)
    b1 = b.reshape(1).astype(jnp.float32)

    cost = pl.CostEstimate(
        flops=2 * n, transcendentals=0, bytes_accessed=2 * n * itemsize)

    out2d = pl.pallas_call(
        _linear_kernel,
        out_shape=jax.ShapeDtypeStruct((rows, LANES), dtype),
        grid_spec=pl.GridSpec(
            grid=(num_tiles,),
            in_specs=[
                pl.BlockSpec(memory_space=pltpu.MemorySpace.SMEM),   # w scalar
                pl.BlockSpec(memory_space=pltpu.MemorySpace.SMEM),   # b scalar
                pl.BlockSpec((tile_rows, LANES), lambda i: (i, 0)),  # x tile
            ],
            out_specs=pl.BlockSpec((tile_rows, LANES), lambda i: (i, 0)),
        ),
        compiler_params=pltpu.CompilerParams(
            dimension_semantics=("parallel",),
        ),
        cost_estimate=cost,
    )(w1, b1, x2d)

    if tail_pad == 0:
        return out2d.reshape(n, 1)            # free reshape, no copy
    return out2d.reshape(-1)[:n].reshape(n, 1)


if __name__ == "__main__":
    key = jax.random.PRNGKey(0)
    kx, kw, kb = jax.random.split(key, 3)

    w = jax.random.uniform(kw, (1, 1), minval=-1.0, maxval=1.0, dtype=jnp.float32)
    b = jax.random.uniform(kb, (1,), minval=-1.0, maxval=1.0, dtype=jnp.float32)

    # 1) Fast path: N multiple of 128 -> no pad / no slice; small tile_rows so
    #    the grid has several steps and the last block is partial (23 rows / 8).
    n1 = 3072
    x1 = jax.random.normal(kx, (n1, 1), dtype=jnp.float32)
    out1 = linear_forward(x1, w, b, tile_rows=8, force_pallas=True)
    out1 = jax.block_until_ready(out1)
    ref1 = x1 @ w.T + b
    assert out1.shape == (n1, 1)
    assert jnp.allclose(out1, ref1, atol=1e-6), "fast-path mismatch vs reference"

    # 2) Ragged N (not a multiple of 128): exercises the padded fallback path.
    n2 = 2500
    x2 = jax.random.normal(kx, (n2, 1), dtype=jnp.float32)
    out2 = linear_forward(x2, w, b, tile_rows=8, force_pallas=True)
    out2 = jax.block_until_ready(out2)
    ref2 = x2 @ w.T + b
    assert out2.shape == (n2, 1)
    assert jnp.allclose(out2, ref2, atol=1e-6), "ragged-path mismatch vs reference"

    print("KERNEL_OK")
</pallas_src>

<mosaic_0001>
module attributes {stable_mosaic.version = 11 : i64} {
  func.func @_linear_kernel(%arg0: i32, %arg1: memref<1xf32, #tpu.memory_space<smem>>, %arg2: memref<1xf32, #tpu.memory_space<smem>>, %arg3: memref<8x128xf32, #tpu.memory_space<vmem>>, %arg4: memref<8x128xf32, #tpu.memory_space<vmem>>) attributes {dimension_semantics = [#tpu.dimension_semantics<parallel>], iteration_bounds = array<i64: 3>, scalar_prefetch = 0 : i64, scratch_operands = 0 : i64, tpu.core_type = #tpu.core_type<tc>, window_params = [{transform_indices = @transform_0, window_bounds = array<i64: 1>}, {transform_indices = @transform_1, window_bounds = array<i64: 1>}, {transform_indices = @transform_2, window_bounds = array<i64: 8, 128>}, {transform_indices = @transform_3, window_bounds = array<i64: 8, 128>}]} {
    %c0 = arith.constant 0 : index
    %c0_0 = arith.constant 0 : index
    %0 = vector.load %arg3[%c0, %c0_0] : memref<8x128xf32, #tpu.memory_space<vmem>>, vector<8x128xf32>
    %c0_1 = arith.constant 0 : index
    %1 = memref.load %arg1[%c0_1] : memref<1xf32, #tpu.memory_space<smem>>
    %2 = vector.broadcast %1 : f32 to vector<8x128xf32>
    %3 = arith.mulf %0, %2 : vector<8x128xf32>
    %c0_2 = arith.constant 0 : index
    %4 = memref.load %arg2[%c0_2] : memref<1xf32, #tpu.memory_space<smem>>
    %5 = vector.broadcast %4 : f32 to vector<8x128xf32>
    %6 = arith.addf %3, %5 : vector<8x128xf32>
    %c0_3 = arith.constant 0 : index
    %c0_4 = arith.constant 0 : index
    %7 = vector.load %arg4[%c0_3, %c0_4] : memref<8x128xf32, #tpu.memory_space<vmem>>, vector<8x128xf32>
    tpu.vector_store %arg4[%c0_3, %c0_4], %6 {strides = array<i32>} : memref<8x128xf32, #tpu.memory_space<vmem>>, vector<8x128xf32>,
    return
  }
  func.func @transform_0(%arg0: i32) -> i32 {
    %c0_i32 = arith.constant 0 : i32
    %c0_i32_0 = arith.constant 0 : i32
    return %c0_i32 : i32
  }
  func.func @transform_1(%arg0: i32) -> i32 {
    %c0_i32 = arith.constant 0 : i32
    %c0_i32_0 = arith.constant 0 : i32
    return %c0_i32 : i32
  }
  func.func @transform_2(%arg0: i32) -> (i32, i32) {
    %c0_i32 = arith.constant 0 : i32
    %c0_i32_0 = arith.constant 0 : i32
    return %arg0, %c0_i32 : i32, i32
  }
  func.func @transform_3(%arg0: i32) -> (i32, i32) {
    %c0_i32 = arith.constant 0 : i32
    %c0_i32_0 = arith.constant 0 : i32
    return %arg0, %c0_i32 : i32, i32
  }
}

</mosaic_0001>

<bundles_post_ra>
// kernel: tpu_custom_call.1
= control target key start
LH: loop header
LB: loop body
LE: loop exit
PB: predicated region body
PF: predicated region fallthrough
CT: control target
= control target key end

     0   :  { %s591_s0 = inlined_call_operand.<no memory space> [shape: f32[1], index: 0, kind: input, shape index: {}]   ;;  %s592_s1 = inlined_call_operand.<no memory space> [shape: f32[1], index: 1, kind: input, shape index: {}]   ;;  %s593_s2 = inlined_call_operand.hbm [shape: f32[24,128], index: 2, kind: input, shape index: {}]   ;;  %s594_s3 = inlined_call_operand.hbm [shape: f32[24,128], index: 3, kind: output, shape index: {}]  }
   0x1   :  { %8 = sst [smem:[#allocation2]] %s591_s0 }
   0x2   :  { %9 = sst [smem:[#allocation3]] %s592_s1 }
   0x3   :  { %10 = vsyncpa [#allocation5], 0 }
   0x4   :  { %12 = vsyncpa [#allocation5 + $0x1], 0 }
   0x5   :  { %13 = vsyncpa [#allocation6], 0 }
   0x6   :  { %15 = vsyncpa [#allocation6 + $0x1], 0  ;;  %s466_s16 = smov 0   ;;  %s468_s17 = smov 0  }
   0x7   :  { %s470_s18 = smov 0   ;;  %s472_s19 = smov 0  }
   0x8 LB: > { %s487_s0 = sadd.s32 4294967295, %s438_s19   ;;  %s284_s1 = sadd.s32 4294967294, %s438_s19   ;;  %s438_s19 = sphi %s472_s19, %s603_s19   ;;  %s434_s18 = sphi %s470_s18, %s602_s18   ;;  %s430_s17 = sphi %s468_s17, %s601_s17   ;;  %s426_s16 = sphi %s466_s16, %s600_s16  }
   0x9   : > { %s491_s20 = sadd.s32 1, %s438_s19   ;;  %s70_s21 = sadd.s32 1, %s434_s18 }
   0xa   : > { %s67_s22 = ssub.s32 %s438_s19, %s491_s20  ;;  %p77_p0 = scmp.ne.s32.totalorder %s434_s18, %s430_s17 }
   0xb   : > { %p68_p1 = scmp.eq.s32.totalorder %s67_s22, 0  ;;  %p78_p2 = scmp.eq.s32.totalorder %s438_s19, 0 }
   0xc   : > { %p83_p3 = scmp.ne.s32.totalorder %s430_s17, %s426_s16  ;;  %p84_p4 = scmp.eq.s32.totalorder %s487_s0, 0 }
   0xd   : > { %s503_s23 = scalar_select %p68_p1, %s434_s18, %s70_s21  }
   0xe   : > { %p505_p5 = por %p78_p2, %p77_p0  ;;  %p509_p6 = por %p84_p4, %p83_p3 }
   0xf   : > { %p107_p7 = scmp.eq.s32.totalorder %s487_s0, 2  ;;  %p113_p8 = scmp.eq.s32.totalorder %s284_s1, 2 }
  0x10   : > { %p308_p9 = scmp.lt.s32.totalorder %s438_s19, 3  ;;  %s139_s28 = sand.u32 1, %s434_s18  }
  0x11   : > { %p515_p10 = por %p107_p7, %p77_p0  ;;  %p519_p11 = por %p113_p8, %p83_p3 }
  0x12   : > { %s288_s29 = sshll.u32 %s438_s19, 3  ;;  %s287_s30 = sshll.u32 %s139_s28, 3 }
  0x13   : > { %s147_s6 = scalar_lea.hbm %s593_s2, %s288_s29  ;;  %s143_s8 = scalar_lea.vmem [#allocation4], %s287_s30 }
  0x14   : > { %s149_s7 = sshll.u32 %s147_s6, 4  ;;  %s151_s9 = sshll.u32 %s143_s8, 4  ;;  %s150_s7 = int_to_ptr.hbm [resolvable:$true] %s149_s7  ;;  %s152_s9 = int_to_ptr.vmem [resolvable:$true] %s151_s9 }
  0x15   : > { %p530_p12 = pnand %p308_p9, %p505_p5  ;;  %p289_p13 = scmp.ge.s32.totalorder %s438_s19, 1 }
  0x16   : > { %p156_p0 = scmp.lt.s32.totalorder %s438_s19, 4  ;;  %s140_s11 = scalar_lea.sflag [#allocation5], %s139_s28 }
  0x17   : > { %s342_s12 = sshra.s32 %s150_s7, 4  ;;  %p346_p2 = pneg %p530_p12  ;;  %s343_s12 = int_to_ptr.hbm [resolvable:$true] %s342_s12 }
  0x18   : > { %s344_s13 = scalar_lea.hbm %s343_s12, 8  ;;  %s349_s1 = scalar_lea.hbm %s593_s2, 24 }
  0x19   : > { %p345_p1 = scmp.ne.s32.totalorder %s343_s12, %s344_s13  ;;  %p350_p5 = scmp.lt.s32.totalorder %s343_s12, %s593_s2 }
  0x1a   : > { %p351_p7 = scmp.lt.s32.totalorder %s349_s1, %s344_s13 }
  0x1b   : > { %p347_p3 = pnand %p346_p2, %p345_p1 }
  0x1c   : > { %p352_p8 = por %p351_p7, %p350_p5 }
  0x1d   : > { %p348_p4 = pneg %p347_p3 }
  0x1f   : > { %p353_p9 = pnand %p352_p8, %p348_p4 }
  0x21   : > { %356 = shalt.err (!%p353_p9)
}
  0x22   : > { %303 = dma.hbm_to_vmem [thread:$0]  (!%p530_p12), %s150_s7, 128, %s152_s9, %s140_s11  }
  0x23   : > { %p157_p1 = pnand %p289_p13, %p156_p0 }
  0x24   : > { %s551_s24 = sand.u32 (!%p157_p1), 1, %s430_s17  }
  0x25   : > { %160 = sbr.rel (%p157_p1) target bundleno = 59 (0x3b), region = 32  ;;  %s290_s28 = sshll.u32 (!%p157_p1), %s551_s24, 3 }
  0x26   : > { %s163_s29 = scalar_lea.sflag (!%p157_p1), [#allocation5], %s551_s24  ;;  %s166_s30 = scalar_lea.vmem (!%p157_p1), [#allocation4], %s290_s28 }
  0x2a   : > { %417 = dma.done.wait (%p509_p6), %s163_s29, 128  }
  0x2b   : > { %419 = vsyncadd (%p509_p6), %s163_s29, 4294967168  ;;  %s191_s4 = sld [smem:[#allocation2]]  ;;  %s293_s6 = sshll.u32 %s487_s0, 3  ;;  %v190_v0 = vld [vmem:[%s166_s30] sm:$0xff] }
  0x2c   : > { %s194_s5 = sld [smem:[#allocation3]]  ;;  %s209_s9 = scalar_lea.hbm %s594_s3, %s293_s6 }
  0x2d   : > { %s189_s10 = scalar_lea.vmem [#allocation7], %s290_s28  ;;  %s213_s12 = sshll.u32 %s209_s9, 4  ;;  %s214_s12 = int_to_ptr.hbm [resolvable:$true] %s213_s12 }
  0x2e   : > { %s211_s11 = sshll.u32 %s189_s10, 4  ;;  %s199_s25 = scalar_lea.sflag [#allocation6], %s551_s24  ;;  %s212_s11 = int_to_ptr.vmem [resolvable:$true] %s211_s11 }
  0x2f   : > { %s386_s13 = sshra.s32 %s214_s12, 4  ;;  %s392_s1 = scalar_lea.hbm %s594_s3, 24  ;;  %s387_s13 = int_to_ptr.hbm [resolvable:$true] %s386_s13 }
  0x30   : > { %s388_s0 = scalar_lea.hbm %s387_s13, 8  ;;  %p393_p0 = scmp.lt.s32.totalorder %s387_s13, %s594_s3 }
  0x31   : > { %v192_v1 = vstv %s191_s4  ;;  %p389_p6 = scmp.ne.s32.totalorder %s387_s13, %s388_s0  ;;  %p394_p2 = scmp.lt.s32.totalorder %s392_s1, %s388_s0 }
  0x32   : > { %v193_v2 = vmul.f32 %v192_v1, %v190_v0  ;;  %v195_v3 = vstv %s194_s5 }
  0x33   : > { %p390_p12 = pnand %p389_p6, %p515_p10  ;;  %p395_p3 = por %p394_p2, %p393_p0 }
  0x34   : > { %v196_v4 = vadd.f32 %v195_v3, %v193_v2 }
  0x35   : > { %p391_p13 = pneg %p390_p12 }
  0x36   : > { %197 = vst [vmem:[%s189_s10] sm:$0xff] %v196_v4 }
  0x37   : > { %p396_p4 = pnand %p395_p3, %p391_p13 }
  0x39   : > { %399 = shalt.err (!%p396_p4)
}
  0x3a   : > { %298 = dma.vmem_to_hbm [thread:$0]  (%p515_p10), %s212_s11, 128, %s214_s12, %s199_s25  }
  0x3b PF: > { %p309_p5 = scmp.ge.s32.totalorder %s438_s19, 2  ;;  %s225_s24 = sand.u32 1, %s426_s16  }
  0x3c   : > { %s226_s28 = scalar_lea.sflag [#allocation6], %s225_s24 }
  0x3d   : > { %p305_p7 = pnand %p309_p5, %p519_p11 }
  0x3f   : > { %p306_p8 = pneg %p305_p7 }
  0x41   : > { %421 = dma.done.wait (%p306_p8), %s226_s28, 128  }
  0x42   : > { %423 = vsyncadd (%p306_p8), %s226_s28, 4294967168  ;;  %p18_p9 = scmp.ge.s32.totalorder %s491_s20, 5   ;;  %s600_s16 = smov %s430_s17 }
  0x43   : > { %s601_s17 = smov %s434_s18  ;;  %s602_s18 = smov %s503_s23 }
  0x44   : > { %s603_s19 = smov %s491_s20  ;;  %20 = sbr.rel (!%p18_p9) target bundleno = 8 (0x8), region = 77 }
  0x49   :  { %232 = vsyncpa [#allocation5], 1 }
  0x4a   :  { %234 = vsyncpa [#allocation5 + $0x1], 1 }
  0x4b   :  { %235 = vsyncpa [#allocation6], 1 }
  0x4c   :  { %237 = vsyncpa [#allocation6 + $0x1], 1 }

</bundles_post_ra>
